<compile_context>
chip_gen: v7x
topology: tpu7x:2x2x1
jax: 0.10.0
libtpu: 0.0.40
codegen_flags: <defaults>
</compile_context>

<pallas_src>
import jax
import jax.numpy as jnp
from jax.experimental import pallas as pl
from jax.experimental.pallas import tpu as pltpu

CN_EPS = 1e-3   # context-norm eps (tf.nn.batch_normalization var_eps in the original)
BN_EPS = 1e-5   # batch-norm eps (nn.BatchNorm default)
LANE = 128
SUBLANE = 8


def _round_up(v, m):
    return (v + m - 1) // m * m


# ----------------------------------------------------------------------------
# Fused whole-network kernel
# ----------------------------------------------------------------------------
def _fused_net_kernel(x_ref, w_in_ref, b_in_ref,
                      wa_ref, s1_ref, t1_ref,
                      w2_ref, s2_ref, t2_ref,
                      o_ref):
    """One grid step = (one batch tile, one resnet block).

    grid = (B // bt, depth).  o_ref is the accumulator: its block index is
    constant over the depth axis, so the activation stays resident in VMEM
    across all depth steps and is written back to HBM once per batch tile.
    The stacked per-block weights have constant index maps (resident); the
    current layer is selected with program_id(1).
    """
    d = pl.program_id(1)
    Bt, N, C = o_ref.shape
    M = Bt * N

    # ---- depth step 0: input conv (Cin -> C), no norm / act -----------------
    @pl.when(d == 0)
    def _():
        x = x_ref[...].reshape(M, x_ref.shape[-1])          # bf16
        y = jnp.dot(x, w_in_ref[...], preferred_element_type=jnp.float32)
        o_ref[...] = (y + b_in_ref[...]).reshape(Bt, N, C)

    def cn_bn_relu(y2, scale, shift):
        # Context norm (per-sample, per-channel stats over the N points) fused
        # with eval-mode batch norm (running stats, no affine) + ReLU.  Stats
        # in f32; one-pass variance clamped at 0.
        y = y2.reshape(Bt, N, C)
        mu = jnp.mean(y, axis=1, keepdims=True)
        var = jnp.maximum(jnp.mean(y * y, axis=1, keepdims=True) - mu * mu, 0.0)
        s = jax.lax.rsqrt(var + CN_EPS) * scale              # fold BN scale in
        return jnp.maximum((y - mu) * s - shift, 0.0)

    # ---- one resnet block (2 matmuls: preconv already folded into conv1) ----
    res = o_ref[...]                                          # (Bt, N, C) f32
    h = jnp.dot(res.reshape(M, C).astype(jnp.bfloat16), wa_ref[d],
                preferred_element_type=jnp.float32)
    h = cn_bn_relu(h, s1_ref[d], t1_ref[d])                   # (Bt, N, C) f32
    h = jnp.dot(h.reshape(M, C).astype(jnp.bfloat16), w2_ref[d],
                preferred_element_type=jnp.float32)
    h = cn_bn_relu(h, s2_ref[d], t2_ref[d])
    o_ref[...] = h + res                                      # residual add


# ----------------------------------------------------------------------------
# Tiling / VMEM budgeting
# ----------------------------------------------------------------------------
def _estimate_residency(bt, N, cin_p, c_p, depth):
    out_t = 2 * bt * N * c_p * 4            # double-buffered f32 output/accumulator
    x_t = 2 * bt * N * cin_p * 2            # double-buffered bf16 input tile
    w = 2 * (cin_p * c_p * 2 + c_p * 4      # conv_in weights + bias
             + 2 * depth * c_p * c_p * 2    # stacked wa / w2 (bf16)
             + 4 * depth * c_p * 4)         # stacked s1/t1/s2/t2 (f32)
    inter = 2 * bt * N * c_p * 4            # in-kernel intermediates headroom
    return out_t + x_t + w + inter


def _pick_bt(B, N, cin_p, c_p, depth, budget_bytes=28 * 1024 * 1024):
    """Largest divisor of B fitting the VMEM budget, keeping >= 2 parallel grid
    points when possible (v7x has 2 TensorCores)."""
    best = 1
    for bt in range(1, B + 1):
        if B % bt != 0:
            continue
        if B // bt < min(2, B):
            continue
        if _estimate_residency(bt, N, cin_p, c_p, depth) <= budget_bytes:
            best = bt
    return best


def net_forward(x, fused, nchannel):
    """x: [B, 1, N, C_in] (NHWC, H == 1).  fused: stacked/folded params.
    nchannel: original (unpadded) output channel count (static)."""
    B, H, N, Cin = x.shape
    assert H == 1
    assert N % SUBLANE == 0  # TODO(synk): pad the point axis for N not a multiple of 8
    cin_p, c_p = fused["w_in"].shape
    depth = fused["wa"].shape[0]

    x3 = x.reshape(B, N, Cin).astype(jnp.float32)
    if Cin < cin_p:
        x3 = jnp.pad(x3, ((0, 0), (0, 0), (0, cin_p - Cin)))
    x3 = x3.astype(jnp.bfloat16)

    bt = _pick_bt(B, N, cin_p, c_p, depth)
    grid = (B // bt, depth)
    vmem_limit = int(min(max(2 * _estimate_residency(bt, N, cin_p, c_p, depth)
                             + (8 << 20), 32 << 20), 48 << 20))

    bmap = lambda b, d: (b, 0, 0)       # batch tile, constant over depth
    cmap2 = lambda b, d: (0, 0)         # conv_in params, constant (resident)
    cmap3 = lambda b, d: (0, 0, 0)      # full weight stack, constant (resident)

    in_specs = [
        pl.BlockSpec((bt, N, cin_p), bmap),           # x
        pl.BlockSpec((cin_p, c_p), cmap2),            # w_in (bf16)
        pl.BlockSpec((1, c_p), cmap2),                # b_in (f32)
        pl.BlockSpec((depth, c_p, c_p), cmap3),       # wa = w_pre @ w1 (bf16)
        pl.BlockSpec((depth, 1, c_p), cmap3),         # s1 = rsqrt(rv1+eps)
        pl.BlockSpec((depth, 1, c_p), cmap3),         # t1 = rm1 * s1
        pl.BlockSpec((depth, c_p, c_p), cmap3),       # w2 (bf16)
        pl.BlockSpec((depth, 1, c_p), cmap3),         # s2
        pl.BlockSpec((depth, 1, c_p), cmap3),         # t2
    ]

    out = pl.pallas_call(
        _fused_net_kernel,
        out_shape=jax.ShapeDtypeStruct((B, N, c_p), jnp.float32),
        grid=grid,
        in_specs=in_specs,
        out_specs=pl.BlockSpec((bt, N, c_p), bmap),
        compiler_params=pltpu.CompilerParams(
            dimension_semantics=("parallel", "arbitrary"),
            vmem_limit_bytes=vmem_limit),
    )(x3, fused["w_in"], fused["b_in"],
      fused["wa"], fused["s1"], fused["t1"],
      fused["w2"], fused["s2"], fused["t2"])

    return out[:, :, :nchannel].reshape(B, 1, N, nchannel)


# ----------------------------------------------------------------------------
# Parameter init (deterministic, synthetic) + fused-layout preparation
# ----------------------------------------------------------------------------
def _init_linear(key, cin, cout):
    kw, kb = jax.random.split(key)
    scale = 1.0 / jnp.sqrt(jnp.float32(cin))
    return {
        "w": jax.random.normal(kw, (cin, cout), jnp.float32) * scale,
        "b": jax.random.normal(kb, (1, cout), jnp.float32) * 0.01,
    }


def _init_conv_post(key, cin, cout):
    k1, k2 = jax.random.split(key)
    p = _init_linear(k1, cin, cout)
    p["rm"] = jax.random.normal(k2, (1, cout), jnp.float32) * 0.05  # BN running mean
    p["rv"] = jnp.ones((1, cout), jnp.float32)                       # BN running var
    return p


def init_net_params(key, in_channel, nchannel, depth):
    keys = jax.random.split(key, 1 + 3 * depth)
    params = {"conv_in": _init_linear(keys[0], in_channel, nchannel), "blocks": []}
    for i in range(depth):
        params["blocks"].append({
            "pre": _init_linear(keys[1 + 3 * i], nchannel, nchannel),
            "c1": _init_conv_post(keys[2 + 3 * i], nchannel, nchannel),
            "c2": _init_conv_post(keys[3 + 3 * i], nchannel, nchannel),
        })
    return params


def fuse_params(params):
    """Stack per-block params along depth, fold preconv into conv1, drop the
    biases that cancel under context norm, pre-fold BN eval stats, zero-pad
    channels to a lane-dense 128 and cast matmul weights to bf16."""
    conv_in = params["conv_in"]
    blocks = params["blocks"]
    cin, c = conv_in["w"].shape
    cin_p = _round_up(cin, SUBLANE)
    c_p = _round_up(c, LANE)

    def pad2(a, rows, cols):
        return jnp.pad(a, ((0, rows - a.shape[0]), (0, cols - a.shape[1])))

    fused = {
        "w_in": pad2(conv_in["w"], cin_p, c_p).astype(jnp.bfloat16),
        "b_in": pad2(conv_in["b"], 1, c_p).astype(jnp.float32),
    }

    wa, w2, s1, t1, s2, t2 = [], [], [], [], [], []
    for blk in blocks:
        # preconv -> conv1 has no norm/activation in between, so the matmuls
        # commute; b_pre/b1/b2 are per-channel constants over the point axis
        # and cancel exactly under the context-norm mean subtraction.
        wa.append(pad2(blk["pre"]["w"] @ blk["c1"]["w"], c_p, c_p).astype(jnp.bfloat16))
        w2.append(pad2(blk["c2"]["w"], c_p, c_p).astype(jnp.bfloat16))
        for tag, s_l, t_l in (("c1", s1, t1), ("c2", s2, t2)):
            inv = jax.lax.rsqrt(blk[tag]["rv"] + BN_EPS)
            s_l.append(pad2(inv, 1, c_p))                 # BN scale
            t_l.append(pad2(blk[tag]["rm"] * inv, 1, c_p))  # BN shift
    fused["wa"] = jnp.stack(wa)
    fused["w2"] = jnp.stack(w2)
    fused["s1"] = jnp.stack(s1)
    fused["t1"] = jnp.stack(t1)
    fused["s2"] = jnp.stack(s2)
    fused["t2"] = jnp.stack(t2)
    return fused


# ----------------------------------------------------------------------------
# Pure-JAX f32 reference (unfused, faithful to the module) for correctness
# ----------------------------------------------------------------------------
def _ref_linear(x, p):
    return jnp.einsum("bnc,cd->bnd", x, p["w"]) + p["b"]


def _ref_conv_post(x, p):
    y = _ref_linear(x, p)
    mu = jnp.mean(y, axis=1, keepdims=True)
    var = jnp.mean((y - mu) ** 2, axis=1, keepdims=True)
    y = (y - mu) / jnp.sqrt(var + CN_EPS)
    y = (y - p["rm"]) / jnp.sqrt(p["rv"] + BN_EPS)
    return jnp.maximum(y, 0.0)


def ref_forward(x, params):
    B, H, N, Cin = x.shape
    h = x.reshape(B, N, Cin).astype(jnp.float32)
    h = _ref_linear(h, params["conv_in"])
    for blk in params["blocks"]:
        res = h
        h = _ref_linear(h, blk["pre"])
        h = _ref_conv_post(h, blk["c1"])
        h = _ref_conv_post(h, blk["c2"]) + res
    return h.reshape(B, 1, N, -1)


# ----------------------------------------------------------------------------
if __name__ == "__main__":
    # Small config consistent with the module's __init__:
    #   in_channel=4, net_nchannel=32, net_depth=3, net_batchnorm=True,
    #   net_gcnorm=True, net_act_pos='post'.
    B, N = 2, 64
    in_channel, nchannel, depth = 4, 32, 3

    key = jax.random.PRNGKey(0)
    kx, kp = jax.random.split(key)
    x = jax.random.normal(kx, (B, 1, N, in_channel), jnp.float32)
    params = init_net_params(kp, in_channel, nchannel, depth)
    fused = fuse_params(params)

    fwd = jax.jit(net_forward, static_argnums=2)
    out = jax.block_until_ready(fwd(x, fused, nchannel))
    ref = jax.block_until_ready(ref_forward(x, params))

    assert out.shape == (B, 1, N, nchannel), out.shape
    # Kernel uses bf16 MXU operands (f32 accumulation / stats); compare against
    # the full-f32 reference with a tolerance sized for bf16 matmul rounding.
    diff = jnp.abs(out - ref)
    assert jnp.allclose(out, ref, atol=1e-1, rtol=5e-2), float(jnp.max(diff))
    assert float(jnp.mean(diff)) < 3e-2, float(jnp.mean(diff))

    # TODO(synk): BatchNorm is implemented in eval mode with synthetic running
    # stats (center=False/scale=False as in the original TF code); training-mode
    # batch statistics are not reproduced.
    print("KERNEL_OK")
</pallas_src>

<mosaic_0001>
module attributes {stable_mosaic.version = 11 : i64} {
  func.func @_fused_net_kernel(%arg0: i32, %arg1: i32, %arg2: memref<1x64x8xbf16, #tpu.memory_space<vmem>>, %arg3: memref<8x128xbf16, #tpu.memory_space<vmem>>, %arg4: memref<1x128xf32, #tpu.memory_space<vmem>>, %arg5: memref<3x128x128xbf16, #tpu.memory_space<vmem>>, %arg6: memref<3x1x128xf32, #tpu.memory_space<vmem>>, %arg7: memref<3x1x128xf32, #tpu.memory_space<vmem>>, %arg8: memref<3x128x128xbf16, #tpu.memory_space<vmem>>, %arg9: memref<3x1x128xf32, #tpu.memory_space<vmem>>, %arg10: memref<3x1x128xf32, #tpu.memory_space<vmem>>, %arg11: memref<1x64x128xf32, #tpu.memory_space<vmem>>) attributes {dimension_semantics = [#tpu.dimension_semantics<parallel>, #tpu.dimension_semantics<arbitrary>], iteration_bounds = array<i64: 2, 3>, scalar_prefetch = 0 : i64, scratch_operands = 0 : i64, tpu.core_type = #tpu.core_type<tc>, window_params = [{transform_indices = @transform_0, window_bounds = array<i64: 1, 64, 8>}, {pipeline_mode = #tpu.pipeline_mode<synchronous>, transform_indices = @transform_1, window_bounds = array<i64: 8, 128>}, {pipeline_mode = #tpu.pipeline_mode<synchronous>, transform_indices = @transform_2, window_bounds = array<i64: 1, 128>}, {pipeline_mode = #tpu.pipeline_mode<synchronous>, transform_indices = @transform_3, window_bounds = array<i64: 3, 128, 128>}, {pipeline_mode = #tpu.pipeline_mode<synchronous>, transform_indices = @transform_4, window_bounds = array<i64: 3, 1, 128>}, {pipeline_mode = #tpu.pipeline_mode<synchronous>, transform_indices = @transform_5, window_bounds = array<i64: 3, 1, 128>}, {pipeline_mode = #tpu.pipeline_mode<synchronous>, transform_indices = @transform_6, window_bounds = array<i64: 3, 128, 128>}, {pipeline_mode = #tpu.pipeline_mode<synchronous>, transform_indices = @transform_7, window_bounds = array<i64: 3, 1, 128>}, {pipeline_mode = #tpu.pipeline_mode<synchronous>, transform_indices = @transform_8, window_bounds = array<i64: 3, 1, 128>}, {transform_indices = @transform_9, window_bounds = array<i64: 1, 64, 128>}]} {
    %c0_i32 = arith.constant 0 : i32
    %0 = arith.cmpi eq, %arg1, %c0_i32 : i32
    %1 = arith.extui %0 : i1 to i32
    %c0_i32_0 = arith.constant 0 : i32
    %2 = arith.cmpi ne, %1, %c0_i32_0 : i32
    scf.if %2 {
      %c0_33 = arith.constant 0 : index
      %c0_34 = arith.constant 0 : index
      %c0_35 = arith.constant 0 : index
      %86 = vector.load %arg2[%c0_33, %c0_34, %c0_35] : memref<1x64x8xbf16, #tpu.memory_space<vmem>>, vector<1x64x8xbf16>
      %87 = vector.shape_cast %86 : vector<1x64x8xbf16> to vector<64x8xbf16>
      %c0_36 = arith.constant 0 : index
      %c0_37 = arith.constant 0 : index
      %88 = vector.load %arg3[%c0_36, %c0_37] : memref<8x128xbf16, #tpu.memory_space<vmem>>, vector<8x128xbf16>
      %cst_38 = arith.constant dense<0.000000e+00> : vector<64x128xf32>
      %89 = tpu.matmul %87, %88, %cst_38 {dimension_numbers = #tpu.dot_dimension_numbers<[1], [0], [0], [1], [0, 0, 1, 1], [], []>} : vector<64x8xbf16>, vector<8x128xbf16>, vector<64x128xf32> -> vector<64x128xf32>
      %c0_39 = arith.constant 0 : index
      %c0_40 = arith.constant 0 : index
      %90 = vector.load %arg4[%c0_39, %c0_40] : memref<1x128xf32, #tpu.memory_space<vmem>>, vector<1x128xf32>
      %91 = vector.broadcast %90 : vector<1x128xf32> to vector<64x128xf32>
      %92 = arith.addf %89, %91 : vector<64x128xf32>
      %93 = vector.shape_cast %92 : vector<64x128xf32> to vector<1x64x128xf32>
      %c0_41 = arith.constant 0 : index
      %c0_42 = arith.constant 0 : index
      %c0_43 = arith.constant 0 : index
      %94 = vector.load %arg11[%c0_41, %c0_42, %c0_43] : memref<1x64x128xf32, #tpu.memory_space<vmem>>, vector<1x64x128xf32>
      tpu.vector_store %arg11[%c0_41, %c0_42, %c0_43], %93 {strides = array<i32>} : memref<1x64x128xf32, #tpu.memory_space<vmem>>, vector<1x64x128xf32>,
    } else {
    }
    %c0 = arith.constant 0 : index
    %c0_1 = arith.constant 0 : index
    %c0_2 = arith.constant 0 : index
    %3 = vector.load %arg11[%c0, %c0_1, %c0_2] : memref<1x64x128xf32, #tpu.memory_space<vmem>>, vector<1x64x128xf32>
    %4 = vector.shape_cast %3 : vector<1x64x128xf32> to vector<64x128xf32>
    %5 = arith.truncf %4 : vector<64x128xf32> to vector<64x128xbf16>
    %6 = arith.index_cast %arg1 : i32 to index
    %c0_3 = arith.constant 0 : index
    %c0_4 = arith.constant 0 : index
    %7 = vector.load %arg5[%6, %c0_3, %c0_4] : memref<3x128x128xbf16, #tpu.memory_space<vmem>>, vector<1x128x128xbf16>
    %8 = vector.shape_cast %7 : vector<1x128x128xbf16> to vector<128x128xbf16>
    %cst = arith.constant dense<0.000000e+00> : vector<64x128xf32>
    %9 = tpu.matmul %5, %8, %cst {dimension_numbers = #tpu.dot_dimension_numbers<[1], [0], [0], [1], [0, 0, 1, 1], [], []>} : vector<64x128xbf16>, vector<128x128xbf16>, vector<64x128xf32> -> vector<64x128xf32>
    %10 = arith.index_cast %arg1 : i32 to index
    %c0_5 = arith.constant 0 : index
    %c0_6 = arith.constant 0 : index
    %11 = vector.load %arg6[%10, %c0_5, %c0_6] : memref<3x1x128xf32, #tpu.memory_space<vmem>>, vector<1x1x128xf32>
    %12 = vector.shape_cast %11 : vector<1x1x128xf32> to vector<1x128xf32>
    %13 = arith.index_cast %arg1 : i32 to index
    %c0_7 = arith.constant 0 : index
    %c0_8 = arith.constant 0 : index
    %14 = vector.load %arg7[%13, %c0_7, %c0_8] : memref<3x1x128xf32, #tpu.memory_space<vmem>>, vector<1x1x128xf32>
    %15 = vector.shape_cast %14 : vector<1x1x128xf32> to vector<1x128xf32>
    %16 = vector.shape_cast %9 : vector<64x128xf32> to vector<1x64x128xf32>
    %cst_9 = arith.constant dense<0.000000e+00> : vector<1x128xf32>
    %17 = vector.multi_reduction <add>, %16, %cst_9 [1] : vector<1x64x128xf32> to vector<1x128xf32>
    %18 = vector.shape_cast %17 : vector<1x128xf32> to vector<1x1x128xf32>
    %cst_10 = arith.constant 6.400000e+01 : f32
    %19 = vector.broadcast %cst_10 : f32 to vector<1x1x128xf32>
    %20 = arith.divf %18, %19 : vector<1x1x128xf32>
    %21 = arith.mulf %16, %16 : vector<1x64x128xf32>
    %cst_11 = arith.constant dense<0.000000e+00> : vector<1x128xf32>
    %22 = vector.multi_reduction <add>, %21, %cst_11 [1] : vector<1x64x128xf32> to vector<1x128xf32>
    %23 = vector.shape_cast %22 : vector<1x128xf32> to vector<1x1x128xf32>
    %cst_12 = arith.constant 6.400000e+01 : f32
    %24 = vector.broadcast %cst_12 : f32 to vector<1x1x128xf32>
    %25 = arith.divf %23, %24 : vector<1x1x128xf32>
    %26 = arith.mulf %20, %20 : vector<1x1x128xf32>
    %27 = arith.subf %25, %26 : vector<1x1x128xf32>
    %cst_13 = arith.constant 0.000000e+00 : f32
    %28 = vector.broadcast %cst_13 : f32 to vector<1x1x128xf32>
    %29 = arith.maximumf %27, %28 : vector<1x1x128xf32>
    %cst_14 = arith.constant 1.000000e-03 : f32
    %30 = vector.broadcast %cst_14 : f32 to vector<1x1x128xf32>
    %31 = arith.addf %29, %30 : vector<1x1x128xf32>
    %32 = math.rsqrt %31 : vector<1x1x128xf32>
    %33 = vector.shape_cast %12 : vector<1x128xf32> to vector<1x1x128xf32>
    %34 = arith.mulf %32, %33 : vector<1x1x128xf32>
    %35 = vector.broadcast %20 : vector<1x1x128xf32> to vector<1x64x128xf32>
    %36 = arith.subf %16, %35 : vector<1x64x128xf32>
    %37 = vector.broadcast %34 : vector<1x1x128xf32> to vector<1x64x128xf32>
    %38 = arith.mulf %36, %37 : vector<1x64x128xf32>
    %39 = vector.shape_cast %15 : vector<1x128xf32> to vector<1x1x128xf32>
    %40 = vector.broadcast %39 : vector<1x1x128xf32> to vector<1x64x128xf32>
    %41 = arith.subf %38, %40 : vector<1x64x128xf32>
    %cst_15 = arith.constant 0.000000e+00 : f32
    %42 = vector.broadcast %cst_15 : f32 to vector<1x64x128xf32>
    %43 = arith.maximumf %41, %42 : vector<1x64x128xf32>
    %44 = vector.shape_cast %43 : vector<1x64x128xf32> to vector<64x128xf32>
    %45 = arith.truncf %44 : vector<64x128xf32> to vector<64x128xbf16>
    %46 = arith.index_cast %arg1 : i32 to index
    %c0_16 = arith.constant 0 : index
    %c0_17 = arith.constant 0 : index
    %47 = vector.load %arg8[%46, %c0_16, %c0_17] : memref<3x128x128xbf16, #tpu.memory_space<vmem>>, vector<1x128x128xbf16>
    %48 = vector.shape_cast %47 : vector<1x128x128xbf16> to vector<128x128xbf16>
    %cst_18 = arith.constant dense<0.000000e+00> : vector<64x128xf32>
    %49 = tpu.matmul %45, %48, %cst_18 {dimension_numbers = #tpu.dot_dimension_numbers<[1], [0], [0], [1], [0, 0, 1, 1], [], []>} : vector<64x128xbf16>, vector<128x128xbf16>, vector<64x128xf32> -> vector<64x128xf32>
    %50 = arith.index_cast %arg1 : i32 to index
    %c0_19 = arith.constant 0 : index
    %c0_20 = arith.constant 0 : index
    %51 = vector.load %arg9[%50, %c0_19, %c0_20] : memref<3x1x128xf32, #tpu.memory_space<vmem>>, vector<1x1x128xf32>
    %52 = vector.shape_cast %51 : vector<1x1x128xf32> to vector<1x128xf32>
    %53 = arith.index_cast %arg1 : i32 to index
    %c0_21 = arith.constant 0 : index
    %c0_22 = arith.constant 0 : index
    %54 = vector.load %arg10[%53, %c0_21, %c0_22] : memref<3x1x128xf32, #tpu.memory_space<vmem>>, vector<1x1x128xf32>
    %55 = vector.shape_cast %54 : vector<1x1x128xf32> to vector<1x128xf32>
    %56 = vector.shape_cast %49 : vector<64x128xf32> to vector<1x64x128xf32>
    %cst_23 = arith.constant dense<0.000000e+00> : vector<1x128xf32>
    %57 = vector.multi_reduction <add>, %56, %cst_23 [1] : vector<1x64x128xf32> to vector<1x128xf32>
    %58 = vector.shape_cast %57 : vector<1x128xf32> to vector<1x1x128xf32>
    %cst_24 = arith.constant 6.400000e+01 : f32
    %59 = vector.broadcast %cst_24 : f32 to vector<1x1x128xf32>
    %60 = arith.divf %58, %59 : vector<1x1x128xf32>
    %61 = arith.mulf %56, %56 : vector<1x64x128xf32>
    %cst_25 = arith.constant dense<0.000000e+00> : vector<1x128xf32>
    %62 = vector.multi_reduction <add>, %61, %cst_25 [1] : vector<1x64x128xf32> to vector<1x128xf32>
    %63 = vector.shape_cast %62 : vector<1x128xf32> to vector<1x1x128xf32>
    %cst_26 = arith.constant 6.400000e+01 : f32
    %64 = vector.broadcast %cst_26 : f32 to vector<1x1x128xf32>
    %65 = arith.divf %63, %64 : vector<1x1x128xf32>
    %66 = arith.mulf %60, %60 : vector<1x1x128xf32>
    %67 = arith.subf %65, %66 : vector<1x1x128xf32>
    %cst_27 = arith.constant 0.000000e+00 : f32
    %68 = vector.broadcast %cst_27 : f32 to vector<1x1x128xf32>
    %69 = arith.maximumf %67, %68 : vector<1x1x128xf32>
    %cst_28 = arith.constant 1.000000e-03 : f32
    %70 = vector.broadcast %cst_28 : f32 to vector<1x1x128xf32>
    %71 = arith.addf %69, %70 : vector<1x1x128xf32>
    %72 = math.rsqrt %71 : vector<1x1x128xf32>
    %73 = vector.shape_cast %52 : vector<1x128xf32> to vector<1x1x128xf32>
    %74 = arith.mulf %72, %73 : vector<1x1x128xf32>
    %75 = vector.broadcast %60 : vector<1x1x128xf32> to vector<1x64x128xf32>
    %76 = arith.subf %56, %75 : vector<1x64x128xf32>
    %77 = vector.broadcast %74 : vector<1x1x128xf32> to vector<1x64x128xf32>
    %78 = arith.mulf %76, %77 : vector<1x64x128xf32>
    %79 = vector.shape_cast %55 : vector<1x128xf32> to vector<1x1x128xf32>
    %80 = vector.broadcast %79 : vector<1x1x128xf32> to vector<1x64x128xf32>
    %81 = arith.subf %78, %80 : vector<1x64x128xf32>
    %cst_29 = arith.constant 0.000000e+00 : f32
    %82 = vector.broadcast %cst_29 : f32 to vector<1x64x128xf32>
    %83 = arith.maximumf %81, %82 : vector<1x64x128xf32>
    %84 = arith.addf %83, %3 : vector<1x64x128xf32>
    %c0_30 = arith.constant 0 : index
    %c0_31 = arith.constant 0 : index
    %c0_32 = arith.constant 0 : index
    %85 = vector.load %arg11[%c0_30, %c0_31, %c0_32] : memref<1x64x128xf32, #tpu.memory_space<vmem>>, vector<1x64x128xf32>
    tpu.vector_store %arg11[%c0_30, %c0_31, %c0_32], %84 {strides = array<i32>} : memref<1x64x128xf32, #tpu.memory_space<vmem>>, vector<1x64x128xf32>,
    return
  }
  func.func @transform_0(%arg0: i32, %arg1: i32) -> (i32, i32, i32) {
    %c0_i32 = arith.constant 0 : i32
    %c0_i32_0 = arith.constant 0 : i32
    %c0_i32_1 = arith.constant 0 : i32
    return %arg0, %c0_i32, %c0_i32_0 : i32, i32, i32
  }
  func.func @transform_1(%arg0: i32, %arg1: i32) -> (i32, i32) {
    %c0_i32 = arith.constant 0 : i32
    %c0_i32_0 = arith.constant 0 : i32
    %c0_i32_1 = arith.constant 0 : i32
    return %c0_i32, %c0_i32_0 : i32, i32
  }
  func.func @transform_2(%arg0: i32, %arg1: i32) -> (i32, i32) {
    %c0_i32 = arith.constant 0 : i32
    %c0_i32_0 = arith.constant 0 : i32
    %c0_i32_1 = arith.constant 0 : i32
    return %c0_i32, %c0_i32_0 : i32, i32
  }
  func.func @transform_3(%arg0: i32, %arg1: i32) -> (i32, i32, i32) {
    %c0_i32 = arith.constant 0 : i32
    %c0_i32_0 = arith.constant 0 : i32
    %c0_i32_1 = arith.constant 0 : i32
    %c0_i32_2 = arith.constant 0 : i32
    return %c0_i32, %c0_i32_0, %c0_i32_1 : i32, i32, i32
  }
  func.func @transform_4(%arg0: i32, %arg1: i32) -> (i32, i32, i32) {
    %c0_i32 = arith.constant 0 : i32
    %c0_i32_0 = arith.constant 0 : i32
    %c0_i32_1 = arith.constant 0 : i32
    %c0_i32_2 = arith.constant 0 : i32
    return %c0_i32, %c0_i32_0, %c0_i32_1 : i32, i32, i32
  }
  func.func @transform_5(%arg0: i32, %arg1: i32) -> (i32, i32, i32) {
    %c0_i32 = arith.constant 0 : i32
    %c0_i32_0 = arith.constant 0 : i32
    %c0_i32_1 = arith.constant 0 : i32
    %c0_i32_2 = arith.constant 0 : i32
    return %c0_i32, %c0_i32_0, %c0_i32_1 : i32, i32, i32
  }
  func.func @transform_6(%arg0: i32, %arg1: i32) -> (i32, i32, i32) {
    %c0_i32 = arith.constant 0 : i32
    %c0_i32_0 = arith.constant 0 : i32
    %c0_i32_1 = arith.constant 0 : i32
    %c0_i32_2 = arith.constant 0 : i32
    return %c0_i32, %c0_i32_0, %c0_i32_1 : i32, i32, i32
  }
  func.func @transform_7(%arg0: i32, %arg1: i32) -> (i32, i32, i32) {
    %c0_i32 = arith.constant 0 : i32
    %c0_i32_0 = arith.constant 0 : i32
    %c0_i32_1 = arith.constant 0 : i32
    %c0_i32_2 = arith.constant 0 : i32
    return %c0_i32, %c0_i32_0, %c0_i32_1 : i32, i32, i32
  }
  func.func @transform_8(%arg0: i32, %arg1: i32) -> (i32, i32, i32) {
    %c0_i32 = arith.constant 0 : i32
    %c0_i32_0 = arith.constant 0 : i32
    %c0_i32_1 = arith.constant 0 : i32
    %c0_i32_2 = arith.constant 0 : i32
    return %c0_i32, %c0_i32_0, %c0_i32_1 : i32, i32, i32
  }
  func.func @transform_9(%arg0: i32, %arg1: i32) -> (i32, i32, i32) {
    %c0_i32 = arith.constant 0 : i32
    %c0_i32_0 = arith.constant 0 : i32
    %c0_i32_1 = arith.constant 0 : i32
    return %arg0, %c0_i32, %c0_i32_0 : i32, i32, i32
  }
}

</mosaic_0001>

<bundles_post_ra>
// kernel: net_forward.1
= control target key start
LH: loop header
LB: loop body
LE: loop exit
PB: predicated region body
PF: predicated region fallthrough
CT: control target
= control target key end

     0   :  { %14 = vsyncpa [#allocation3], 0  ;;  %s1391_s30 = smov 0   ;;  %s1393_s10 = smov 0   ;;  %s1631_s0 = inlined_call_operand.vmem [shape: bf16[2,64,8], index: 0, kind: input, shape index: {}]   ;;  %s1632_s1 = inlined_call_operand.vmem [shape: bf16[8,128], index: 1, kind: input, shape index: {}]   ;;  %s1633_s2 = inlined_call_operand.vmem [shape: f32[1,128], index: 2, kind: input, shape index: {}]   ;;  %s1634_s3 = inlined_call_operand.vmem [shape: bf16[3,128,128], index: 3, kind: input, shape index: {}]   ;;  %s1635_s4 = inlined_call_operand.vmem [shape: f32[3,1,128], index: 4, kind: input, shape index: {}]   ;;  %s1636_s5 = inlined_call_operand.vmem [shape: f32[3,1,128], index: 5, kind: input, shape index: {}]   ;;  %s1637_s6 = inlined_call_operand.hbm [shape: bf16[3,128,128], index: 6, kind: input, shape index: {}]   ;;  %s1638_s7 = inlined_call_operand.vmem [shape: f32[3,1,128], index: 7, kind: input, shape index: {}]   ;;  %s1639_s8 = inlined_call_operand.vmem [shape: f32[3,1,128], index: 8, kind: input, shape index: {}]   ;;  %s1640_s9 = inlined_call_operand.vmem [shape: f32[2,64,128], index: 9, kind: output, shape index: {}]  }
   0x1   :  { %s1395_s11 = smov 0   ;;  %s1397_s12 = smov 0  }
   0x2   :  { %s1399_s13 = smov 0  }
   0x3 LB: > { %s1050_s14 = sadd.s32 4294967295, %s1336_s13   ;;  %s29_s15 = sadd.s32 1, %s1328_s11  ;;  %s1336_s13 = sphi %s1399_s13, %s20_s13   ;;  %s1332_s12 = sphi %s1397_s12, %s1652_s12   ;;  %s1328_s11 = sphi %s1395_s11, %s1651_s11   ;;  %s1324_s10 = sphi %s1393_s10, %s1650_s10   ;;  %s1320_s30 = sphi %s1391_s30, %s1649_s30  }
   0x4   : > { %p30_p0 = scmp.ge.s32.totalorder %s29_s15, 3  ;;  %s32_s16 = sadd.s32 1, %s1332_s12 }
   0x5   : > { %p1052_p1 = scmp.ge.s32.totalorder %s1336_s13, 1  ;;  %p257_p2 = scmp.lt.s32.totalorder %s1336_s13, 7 }
   0x6   : > { %s1654_s15 = smov (%p30_p0, %s29_s15), 0  ;;  %s1656_s16 = smov (!%p30_p0, %s32_s16), %s1332_s12 }
   0x7   : > { %p1424_p3 = pnand %p1052_p1, %p257_p2  ;;  %p34_p4 = scmp.ge.s32.totalorder %s1656_s16, 2 }
   0x8   : > { %p1428_p5 = scmp.eq.s32.totalorder %s1050_s14, 0  ;;  %s1338_s19 = smov [#allocation2]  }
   0x9   : > { %s1644_s17 = scalar_select %p1424_p3, 1, 0 }
   0xa   : > { %s1645_s18 = scalar_select %p1428_p5, 1, 0 }
   0xb   : > { %p1193_p6 = pneg %p1424_p3  ;;  %s1658_s16 = smov (%p34_p4, %s1656_s16), 0 }
   0xc   : > { %s284_s20 = sshll.u32 %s1338_s19, 4  ;;  %s1266_s24 = scalar_lea.hbm %s1637_s6, 3072  ;;  %s285_s20 = int_to_ptr.vmem [resolvable:$true] %s284_s20 }
   0xd   : > { %p1438_p7 = pnand %p1428_p5, %p1193_p6  ;;  %p1267_p8 = scmp.ne.s32.totalorder %s1637_s6, %s1266_s24 }
   0xe   : > { %p1273_p12 = scmp.lt.u32.totalorder %s1266_s24, %s1637_s6 }
   0xf   : > { %p1268_p9 = pneg %p1438_p7 }
  0x11   : > { %p1269_p10 = pnand %p1268_p9, %p1267_p8 }
  0x13   : > { %p1270_p11 = pneg %p1269_p10 }
  0x15   : > { %p1275_p13 = pnand %p1273_p12, %p1270_p11 }
  0x17   : > { %1278 = shalt.err (!%p1275_p13)
}
  0x18   : > { %s1279_s29 = scalar_lea.vmem %s285_s20, 3072  ;;  %p1287_p4 = scmp.lt.s32.totalorder %s285_s20, %s285_s20 }
  0x19   : > { %p1280_p0 = scmp.ne.s32.totalorder %s285_s20, %s1279_s29  ;;  %p1288_p6 = scmp.lt.s32.totalorder %s1279_s29, %s1279_s29 }
  0x1b   : > { %p1282_p1 = pnand %p1280_p0, %p1268_p9  ;;  %p1289_p5 = por %p1288_p6, %p1287_p4 }
  0x1d   : > { %p1283_p2 = pneg %p1282_p1 }
  0x1f   : > { %p1290_p3 = pnand %p1289_p5, %p1283_p2 }
  0x21   : > { %1293 = shalt.err (!%p1290_p3)
}
  0x22   : > { %s1339_s14 = smov 64   ;;  %s1340_s19 = smov 4  }
  0x23   : > { %1196 = dma.hbm_to_vmem [thread:$0]  (!%p1438_p7), %s1637_s6, 3072, %s285_s20, [#allocation3], %s1339_s14, %s1339_s14, %s1340_s19  }
  0x24   : > { %p1647_p8 = scmp.ne.s32.totalorder %s1644_s17, 0 }
  0x25   : > { %p1648_p10 = scmp.ne.s32.totalorder (!%p1647_p8), %s1645_s18, 0 }
  0x26   : > { %314 = sbr.rel (%p1647_p8) target bundleno = 859 (0x35b), region = 56 }
  0x2d   : > { %1315 = dma.done.wait (%p1648_p10), [#allocation3], 3072  }
  0x2e   : > { %1317 = vsyncadd (%p1648_p10), [#allocation3], 4294964224  ;;  %p350_p3 = scmp.lt.s32.totalorder %s1324_s10, 1  ;;  %p1061_p5 = scmp.ne.s32.totalorder %s1320_s30, 0 }
  0x2f   : > { %v373_v0 = vld [vmem:[%s1632_s1] sm:$0xf] (!%p1061_p5)  ;;  %vm414_vm0 = vcmask (!%p1061_p5), 1043456   ;;  %vm401_vm1 = vcmask (!%p1061_p5), 64512  }
  0x30   : > { %s1660_s10 = smov (!%p350_p3, %s1324_s10), 1  ;;  %364 = sbr.rel (%p1061_p5) target bundleno = 271 (0x10f), region = 64 }
  0x31   : > { %s1094_s24 = sshll.u32 %s1660_s10, 5  ;;  %s1095_s25 = sshll.u32 %s1660_s10, 6  ;;  %1187 = vmatprep.subr.msk.bf16.mxu0 (!%p1061_p5), %vm414_vm0, %v373_v0  ;;  %1188 = vmatprep.subr.msk.bf16.mxu1 (!%p1061_p5), %vm414_vm0, %v373_v0  ;;  %v416_v2 = vsel (!%p1061_p5), %vm414_vm0, %v373_v0, 0  ;;  %v1062_v6 = vld [vmem:[%s1633_s2] ss:$0 sm:$0xff] (!%p1061_p5) }
  0x32   : > { %s354_s27 = scalar_lea.vmem %s1631_s0, %s1094_s24  ;;  %s1472_s17 = scalar_lea.vmem %s1640_s9, %s1095_s25  ;;  %1128 = vmatpush3.bf16.msra.mxu0 (!%p1061_p5), %v416_v2  ;;  %1186 = vmatpush3.bf16.msra.mxu1 (!%p1061_p5), %v416_v2 }
  0x33   : > { %v1242_v1 = vld [vmem:[%s354_s27] sm:$0xff] (!%p1061_p5)   ;;  %v1243_v3 = vld [vmem:[%s354_s27 + $0x10] sm:$0xff] (!%p1061_p5)   ;;  %v1244_v4 = vld [vmem:[%s354_s27 + $0x8] sm:$0xff] (!%p1061_p5)  }
  0x34   : > { %1129 = vmatprep.mubr.msk.bf16.mxu0 (!%p1061_p5), %vm401_vm1, %v1242_v1  ;;  %1133 = vmatprep.mubr.msk.bf16.mxu1 (!%p1061_p5), %vm401_vm1, %v1243_v3  ;;  %v1245_v5 = vld [vmem:[%s354_s27 + $0x18] sm:$0xff] (!%p1061_p5)  }
  0x35   : > { %1130 = vmatmul.mubr.msk.bf16.vlgmr.msra.gmra.mrb[0].mxu0 (!%p1061_p5), %vm401_vm1, %v1244_v4  ;;  %1134 = vmatmul.mubr.msk.bf16.vlgmr.msra.gmra.mrb[0].mxu1 (!%p1061_p5), %vm401_vm1, %v1245_v5 }
 0x108   : > { %v1131_v7 = vpop.f32.mrb[0].mxu0  ;;  %v1135_v9 = vpop.f32.mrb[0].mxu1 }
 0x109   : > { %v461_v8 = vadd.f32 %v1131_v7, %v1062_v6  ;;  %v452_v10 = vpop.f32.mrb[1].mxu0  ;;  %v477_v11 = vadd.f32 %v1135_v9, %v1062_v6  ;;  %v468_v13 = vpop.f32.mrb[1].mxu1 }
 0x10a   : > { %v453_v12 = vadd.f32 %v1062_v6, %v452_v10  ;;  %v1132_v14 = vpop.f32.mrb[2].mxu0  ;;  %v469_v15 = vadd.f32 %v1062_v6, %v468_v13  ;;  %v1136_v17 = vpop.f32.mrb[2].mxu1 }
 0x10b   : > { %485 = vst [vmem:[%s1472_s17 + $0x10] sm:$0xff] %v461_v8  ;;  %v464_v16 = vadd.f32 %v1132_v14, %v1062_v6  ;;  %v455_v18 = vpop.f32.mrb[3].mxu0  ;;  %489 = vst [vmem:[%s1472_s17 + $0x30] sm:$0xff] %v477_v11  ;;  %v480_v19 = vadd.f32 %v1136_v17, %v1062_v6  ;;  %v471_v21 = vpop.f32.mrb[3].mxu1 }
 0x10c   : > { %483 = vst [vmem:[%s1472_s17] sm:$0xff] %v453_v12  ;;  %v456_v20 = vadd.f32 %v1062_v6, %v455_v18  ;;  %487 = vst [vmem:[%s1472_s17 + $0x20] sm:$0xff] %v469_v15  ;;  %v472_v22 = vadd.f32 %v1062_v6, %v471_v21 }
 0x10d   : > { %486 = vst [vmem:[%s1472_s17 + $0x18] sm:$0xff] %v464_v16  ;;  %490 = vst [vmem:[%s1472_s17 + $0x38] sm:$0xff] %v480_v19 }
 0x10e   : > { %484 = vst [vmem:[%s1472_s17 + $0x8] sm:$0xff] %v456_v20  ;;  %488 = vst [vmem:[%s1472_s17 + $0x28] sm:$0xff] %v472_v22 }
 0x10f PF: > { %s1096_s19 = sshll.u32 %s1320_s30, 6  ;;  %s635_s27 = scalar_lea.vmem %s1635_s4, %s1320_s30 }
 0x110   : > { %s505_s24 = scalar_lea.vmem %s1634_s3, %s1096_s19  ;;  %s729_s25 = scalar_lea.vmem [#allocation2], %s1096_s19 }
 0x111   : > { %v1246_v26 = vld [vmem:[%s505_s24] sm:$0xff]   ;;  %v1247_v27 = vld [vmem:[%s505_s24 + $0x8] sm:$0xff]   ;;  %v1248_v28 = vld [vmem:[%s505_s24 + $0x10] sm:$0xff]   ;;  %s637_s18 = scalar_lea.vmem %s1636_s5, %s1320_s30  ;;  %s859_s14 = scalar_lea.vmem %s1638_s7, %s1320_s30 }
 0x112   : > { %1137 = vmatprep.subr.bf16.mxu0 %v1246_v26  ;;  %v1249_v29 = vld [vmem:[%s505_s24 + $0x18] sm:$0xff]   ;;  %v1250_v30 = vld [vmem:[%s505_s24 + $0x20] sm:$0xff]   ;;  %v1251_v31 = vld [vmem:[%s505_s24 + $0x28] sm:$0xff]   ;;  %s861_s23 = scalar_lea.vmem %s1639_s8, %s1320_s30 }
 0x113   : > { %v1491_v23 = vld [vmem:[%s1472_s17] sm:$0xff]  ;;  %1138 = vmatpush3.bf16.msra.mxu0 %v1246_v26  ;;  %v1252_v32 = vld [vmem:[%s505_s24 + $0x30] sm:$0xff]   ;;  %v1253_v33 = vld [vmem:[%s505_s24 + $0x38] sm:$0xff]  }
 0x114   : > { %1139 = vmatprep.subr.bf16.mxu0 %v1247_v27  ;;  %v1504_v34 = vld [vmem:[%s1472_s17 + $0x10] sm:$0xff]  ;;  %v1507_v35 = vld [vmem:[%s1472_s17 + $0x18] sm:$0xff]  ;;  %v1510_v36 = vld [vmem:[%s1472_s17 + $0x20] sm:$0xff] }
 0x115   : > { %v1494_v24 = vld [vmem:[%s1472_s17 + $0x8] sm:$0xff]  ;;  %v500_v38 = vpack.c.bf16 %v1507_v35, %v1504_v34  ;;  %v1520_v40 = vld [vmem:[%s1472_s17 + $0x30] sm:$0xff]  ;;  %v1523_v41 = vld [vmem:[%s1472_s17 + $0x38] sm:$0xff] }
 0x116   : > { %v499_v25 = vpack.c.bf16 %v1494_v24, %v1491_v23  ;;  %v1513_v37 = vld [vmem:[%s1472_s17 + $0x28] sm:$0xff]  ;;  %v502_v42 = vpack.c.bf16 %v1523_v41, %v1520_v40  ;;  %v1254_v43 = vld [vmem:[%s729_s25] sm:$0xff]   ;;  %v1256_v45 = vld [vmem:[%s729_s25 + $0x10] sm:$0xff]  }
 0x117   : > { %1140 = vmatpush3.bf16.msra.mxu0 %v1247_v27  ;;  %v501_v39 = vpack.c.bf16 %v1513_v37, %v1510_v36  ;;  %1161 = vmatprep.subr.bf16.mxu1 %v1254_v43  ;;  %v1255_v44 = vld [vmem:[%s729_s25 + $0x8] sm:$0xff]   ;;  %v1257_v46 = vld [vmem:[%s729_s25 + $0x18] sm:$0xff]   ;;  %v1258_v47 = vld [vmem:[%s729_s25 + $0x20] sm:$0xff]  }
 0x118   : > { %1153 = vmatprep.mubr.bf16.mxu0 %v499_v25  ;;  %1141 = vmatprep.subr.bf16.mxu0 %v1248_v28  ;;  %v1259_v48 = vld [vmem:[%s729_s25 + $0x28] sm:$0xff]   ;;  %v1260_v49 = vld [vmem:[%s729_s25 + $0x30] sm:$0xff]   ;;  %v1261_v50 = vld [vmem:[%s729_s25 + $0x38] sm:$0xff]  }
 0x119   : > { %1162 = vmatpush3.bf16.msra.mxu1 %v1254_v43 }
 0x11a   : > { %1163 = vmatprep.subr.bf16.mxu1 %v1255_v44 }
 0x11b   : > { %1142 = vmatpush3.bf16.msra.mxu0 %v1248_v28 }
 0x11c   : > { %1143 = vmatprep.subr.bf16.mxu0 %v1249_v29 }
 0x11d   : > { %1164 = vmatpush3.bf16.msra.mxu1 %v1255_v44 }
 0x11e   : > { %1165 = vmatprep.subr.bf16.mxu1 %v1256_v45 }
 0x11f   : > { %1144 = vmatpush3.bf16.msra.mxu0 %v1249_v29 }
 0x120   : > { %1145 = vmatprep.subr.bf16.mxu0 %v1250_v30 }
 0x121   : > { %1166 = vmatpush3.bf16.msra.mxu1 %v1256_v45 }
 0x122   : > { %1167 = vmatprep.subr.bf16.mxu1 %v1257_v46 }
 0x123   : > { %1146 = vmatpush3.bf16.msra.mxu0 %v1250_v30 }
 0x124   : > { %1147 = vmatprep.subr.bf16.mxu0 %v1251_v31 }
 0x125   : > { %1168 = vmatpush3.bf16.msra.mxu1 %v1257_v46 }
 0x126   : > { %1169 = vmatprep.subr.bf16.mxu1 %v1258_v47 }
 0x127   : > { %1148 = vmatpush3.bf16.msra.mxu0 %v1251_v31 }
 0x128   : > { %1149 = vmatprep.subr.bf16.mxu0 %v1252_v32 }
 0x129   : > { %1170 = vmatpush3.bf16.msra.mxu1 %v1258_v47 }
 0x12a   : > { %1171 = vmatprep.subr.bf16.mxu1 %v1259_v48 }
 0x12b   : > { %1150 = vmatpush3.bf16.msra.mxu0 %v1252_v32 }
 0x12c   : > { %1151 = vmatprep.subr.bf16.mxu0 %v1253_v33 }
 0x12d   : > { %1172 = vmatpush3.bf16.msra.mxu1 %v1259_v48 }
 0x12e   : > { %1173 = vmatprep.subr.bf16.mxu1 %v1260_v49 }
 0x12f   : > { %1152 = vmatpush3.bf16.msra.mxu0 %v1253_v33 }
 0x131   : > { %1174 = vmatpush3.bf16.msra.mxu1 %v1260_v49 }
 0x132   : > { %1154 = vmatmul.mubr.bf16.vlgmr.msra.gmra.mrb[0].mxu0 %v500_v38  ;;  %1175 = vmatprep.subr.bf16.mxu1 %v1261_v50 }
 0x133   : > { %1157 = vmatprep.mubr.bf16.mxu0 %v501_v39 }
 0x135   : > { %1176 = vmatpush3.bf16.msra.mxu1 %v1261_v50 }
 0x13a   : > { %1158 = vmatmul.mubr.bf16.gmra.mrb[4].mxu0 %v502_v42 }
 0x205   : > { %v1529_v51 = vpop.f32.mrb[0].mxu0 }
 0x206   : > { %v1531_v52 = vpop.f32.mrb[1].mxu0  ;;  %v656_v58 = vmul.f32 %v1529_v51, %v1529_v51 }
 0x207   : > { %v1533_v53 = vpop.f32.mrb[2].mxu0  ;;  %v654_v55 = vmul.f32 %v1531_v52, %v1531_v52 }
 0x208   : > { %v1535_v54 = vpop.f32.mrb[3].mxu0  ;;  %v657_v61 = vmul.f32 %v1533_v53, %v1533_v53 }
 0x209   : > { %v639_v56 = vadd.f32 %v1535_v54, %v1531_v52  ;;  %v655_v57 = vmul.f32 %v1535_v54, %v1535_v54 }
 0x20b   : > { %v640_v59 = vadd.f32 %v1529_v51, %v639_v56  ;;  %v662_v60 = vadd.f32 %v655_v57, %v654_v55  ;;  %v690_v55 = vlaneseq }
 0x20d   : > { %v663_v62 = vadd.f32 %v662_v60, %v656_v58  ;;  %v1159_v63 = vpop.f32.mrb[4].mxu0  ;;  %v641_v0 = vadd.f32 %v1533_v53, %v640_v59  ;;  %v1081_v58 = vld [vmem:[%s637_s18] ss:$0 sm:$0xff] }
 0x20e   : > { %v620_v1 = vpop.f32.mrb[5].mxu0  ;;  %v660_v10 = vmul.f32 %v1159_v63, %v1159_v63 }
 0x20f   : > { %v642_v2 = vadd.f32 %v641_v0, %v620_v1  ;;  %v658_v3 = vmul.f32 %v620_v1, %v620_v1  ;;  %v664_v4 = vadd.f32 %v663_v62, %v657_v61  ;;  %v1160_v5 = vpop.f32.mrb[6].mxu0 }
 0x210   : > { %v623_v6 = vpop.f32.mrb[7].mxu0  ;;  %v661_v13 = vmul.f32 %v1160_v5, %v1160_v5 }
 0x211   : > { %v665_v7 = vadd.f32 %v664_v4, %v658_v3  ;;  %v643_v8 = vadd.f32 %v642_v2, %v623_v6  ;;  %v659_v9 = vmul.f32 %v623_v6, %v623_v6 }
 0x213   : > { %v644_v11 = vadd.f32 %v1159_v63, %v643_v8  ;;  %v666_v12 = vadd.f32 %v665_v7, %v659_v9 }
 0x215   : > { %v645_v14 = vadd.f32 %v1160_v5, %v644_v11  ;;  %v667_v15 = vadd.f32 %v666_v12, %v660_v10 }
 0x217   : > { %v646_v16 = vrot.slane %v645_v14, 4  ;;  %v668_v17 = vadd.f32 %v667_v15, %v661_v13 }
 0x219   : > { %v647_v18 = vadd.f32 %v646_v16, %v645_v14  ;;  %v669_v19 = vrot.slane %v668_v17, 4 }
 0x21b   : > { %v648_v20 = vrot.slane %v647_v18, 2  ;;  %v670_v21 = vadd.f32 %v669_v19, %v668_v17 }
 0x21d   : > { %v649_v22 = vadd.f32 %v648_v20, %v647_v18  ;;  %v671_v25 = vrot.slane %v670_v21, 2 }
 0x21f   : > { %v650_v26 = vrot.slane %v649_v22, 1  ;;  %v672_v27 = vadd.f32 %v671_v25, %v670_v21 }
 0x221   : > { %v651_v28 = vadd.f32 %v650_v26, %v649_v22  ;;  %v673_v29 = vrot.slane %v672_v27, 1 }
 0x223   : > { %v653_v30 = vmul.f32 0.015625, %v651_v28  ;;  %v674_v31 = vadd.f32 %v673_v29, %v672_v27 }
 0x225   : > { %v675_v32 = vmul.f32 0.015625, %v674_v31  ;;  %v676_v33 = vmul.f32 %v653_v30, %v653_v30  ;;  %v687_v38 = vsub.f32 %v623_v6, %v653_v30  ;;  %v682_v39 = vsub.f32 %v1531_v52, %v653_v30 }
 0x226   : > { %v683_v42 = vsub.f32 %v1535_v54, %v653_v30  ;;  %v684_v43 = vsub.f32 %v1529_v51, %v653_v30  ;;  %v685_v44 = vsub.f32 %v1533_v53, %v653_v30  ;;  %v686_v45 = vsub.f32 %v620_v1, %v653_v30  ;;  %v636_v54 = vld [vmem:[%s635_s27] sm:$0x1] }
 0x227   : > { %v677_v46 = vsub.f32 %v675_v32, %v676_v33  ;;  %v688_v47 = vsub.f32 %v1159_v63, %v653_v30  ;;  %v689_v48 = vsub.f32 %v1160_v5, %v653_v30  ;;  %v1557_v52 = vshrl.u32 %v690_v55, 7 }
 0x229   : > { %v678_v49 = vmax.f32 %v677_v46, 0.0  ;;  %v692_v56 = vsub.s32 0, %v1557_v52 }
 0x22b   : > { %v679_v50 = vadd.f32 0.001, %v678_v49 }
 0x22d   : > { %1262 = vrsqrt.f32 %v679_v50 }
 0x237   : > { %v1263_v51 = vpop.eup %1262 }
 0x238   : > { %v681_v53 = vmul.f32 %v1263_v51, %v636_v54 }
 0x23a   : > { %v693_v57 = vrot.slane %v681_v53, %v692_v56 }
 0x23c   : > { %v699_v59 = vmul.f32 %v693_v57, %v687_v38  ;;  %v694_v60 = vmul.f32 %v693_v57, %v682_v39  ;;  %v695_v61 = vmul.f32 %v693_v57, %v683_v42  ;;  %v696_v62 = vmul.f32 %v693_v57, %v684_v43 }
 0x23d   : > { %v697_v63 = vmul.f32 %v693_v57, %v685_v44  ;;  %v698_v0 = vmul.f32 %v693_v57, %v686_v45  ;;  %v700_v1 = vmul.f32 %v693_v57, %v688_v47  ;;  %v701_v2 = vmul.f32 %v693_v57, %v689_v48 }
 0x23e   : > { %v713_v3 = vsub.f32 %v699_v59, %v1081_v58  ;;  %v708_v4 = vsub.f32 %v694_v60, %v1081_v58  ;;  %v709_v5 = vsub.f32 %v695_v61, %v1081_v58  ;;  %v710_v6 = vsub.f32 %v696_v62, %v1081_v58 }
 0x23f   : > { %v711_v7 = vsub.f32 %v697_v63, %v1081_v58  ;;  %v712_v8 = vsub.f32 %v698_v0, %v1081_v58  ;;  %v714_v9 = vsub.f32 %v700_v1, %v1081_v58  ;;  %v715_v10 = vsub.f32 %v701_v2, %v1081_v58 }
 0x240   : > { %v716_v11 = vmax.f32 %v708_v4, 0.0  ;;  %v717_v12 = vmax.f32 %v709_v5, 0.0  ;;  %v718_v13 = vmax.f32 %v710_v6, 0.0  ;;  %v721_v14 = vmax.f32 %v713_v3, 0.0 }
 0x241   : > { %v719_v15 = vmax.f32 %v711_v7, 0.0  ;;  %v720_v16 = vmax.f32 %v712_v8, 0.0  ;;  %v722_v17 = vmax.f32 %v714_v9, 0.0  ;;  %v723_v18 = vmax.f32 %v715_v10, 0.0 }
 0x242   : > { %v724_v19 = vpack.c.bf16 %v717_v12, %v716_v11 }
 0x243   : > { %v725_v20 = vpack.c.bf16 %v719_v15, %v718_v13  ;;  %v726_v21 = vpack.c.bf16 %v721_v14, %v720_v16  ;;  %v727_v22 = vpack.c.bf16 %v723_v18, %v722_v17 }
 0x244   : > { %1177 = vmatprep.mubr.bf16.mxu1 %v724_v19 }
 0x245   : > { %1178 = vmatmul.mubr.bf16.vlgmr.msra.gmra.mrb[0].mxu1 %v725_v20 }
 0x246   : > { %1181 = vmatprep.mubr.bf16.mxu1 %v726_v21 }
 0x24d   : > { %1182 = vmatmul.mubr.bf16.gmra.mrb[4].mxu1 %v727_v22 }
 0x318   : > { %v1566_v25 = vpop.f32.mrb[0].mxu1 }
 0x319   : > { %v1568_v26 = vpop.f32.mrb[1].mxu1  ;;  %v879_v32 = vmul.f32 %v1566_v25, %v1566_v25 }
 0x31a   : > { %v1570_v27 = vpop.f32.mrb[2].mxu1  ;;  %v877_v29 = vmul.f32 %v1568_v26, %v1568_v26 }
 0x31b   : > { %v1572_v28 = vpop.f32.mrb[3].mxu1  ;;  %v880_v39 = vmul.f32 %v1570_v27, %v1570_v27 }
 0x31c   : > { %v863_v30 = vadd.f32 %v1572_v28, %v1568_v26  ;;  %v878_v31 = vmul.f32 %v1572_v28, %v1572_v28 }
 0x31e   : > { %v864_v33 = vadd.f32 %v1566_v25, %v863_v30  ;;  %v885_v38 = vadd.f32 %v878_v31, %v877_v29  ;;  %v860_v31 = vld [vmem:[%s859_s14] sm:$0x1] }
 0x320   : > { %v886_v42 = vadd.f32 %v885_v38, %v879_v32  ;;  %v1183_v43 = vpop.f32.mrb[4].mxu1  ;;  %v865_v44 = vadd.f32 %v1570_v27, %v864_v33 }
 0x321   : > { %v844_v45 = vpop.f32.mrb[5].mxu1  ;;  %v883_v53 = vmul.f32 %v1183_v43, %v1183_v43 }
 0x322   : > { %v866_v46 = vadd.f32 %v865_v44, %v844_v45  ;;  %v881_v47 = vmul.f32 %v844_v45, %v844_v45  ;;  %v887_v48 = vadd.f32 %v886_v42, %v880_v39  ;;  %v1184_v49 = vpop.f32.mrb[6].mxu1 }
 0x323   : > { %v847_v50 = vpop.f32.mrb[7].mxu1  ;;  %v884_v59 = vmul.f32 %v1184_v49, %v1184_v49 }
 0x324   : > { %v888_v55 = vadd.f32 %v887_v48, %v881_v47  ;;  %v867_v54 = vadd.f32 %v866_v46, %v847_v50  ;;  %v882_v51 = vmul.f32 %v847_v50, %v847_v50 }
 0x326   : > { %v868_v57 = vadd.f32 %v1183_v43, %v867_v54  ;;  %v889_v58 = vadd.f32 %v888_v55, %v882_v51 }
 0x328   : > { %v869_v60 = vadd.f32 %v1184_v49, %v868_v57  ;;  %v890_v61 = vadd.f32 %v889_v58, %v883_v53 }
 0x32a   : > { %v870_v62 = vrot.slane %v869_v60, 4  ;;  %v891_v63 = vadd.f32 %v890_v61, %v884_v59 }
 0x32c   : > { %v871_v0 = vadd.f32 %v870_v62, %v869_v60  ;;  %v892_v1 = vrot.slane %v891_v63, 4 }
 0x32e   : > { %v872_v2 = vrot.slane %v871_v0, 2  ;;  %v893_v3 = vadd.f32 %v892_v1, %v891_v63 }
 0x330   : > { %v873_v4 = vadd.f32 %v872_v2, %v871_v0  ;;  %v894_v5 = vrot.slane %v893_v3, 2 }
 0x332   : > { %v874_v6 = vrot.slane %v873_v4, 1  ;;  %v895_v7 = vadd.f32 %v894_v5, %v893_v3 }
 0x334   : > { %v875_v8 = vadd.f32 %v874_v6, %v873_v4  ;;  %v896_v9 = vrot.slane %v895_v7, 1 }
 0x336   : > { %v876_v10 = vmul.f32 0.015625, %v875_v8  ;;  %v897_v11 = vadd.f32 %v896_v9, %v895_v7 }
 0x338   : > { %v898_v12 = vmul.f32 0.015625, %v897_v11  ;;  %v899_v13 = vmul.f32 %v876_v10, %v876_v10  ;;  %v905_v14 = vsub.f32 %v1568_v26, %v876_v10  ;;  %v906_v15 = vsub.f32 %v1572_v28, %v876_v10  ;;  %v1091_v28 = vld [vmem:[%s861_s23] ss:$0 sm:$0xff] }
 0x339   : > { %v907_v16 = vsub.f32 %v1566_v25, %v876_v10  ;;  %v908_v17 = vsub.f32 %v1570_v27, %v876_v10  ;;  %v909_v18 = vsub.f32 %v844_v45, %v876_v10  ;;  %v910_v19 = vsub.f32 %v847_v50, %v876_v10 }
 0x33a   : > { %v900_v20 = vsub.f32 %v898_v12, %v899_v13  ;;  %v911_v21 = vsub.f32 %v1183_v43, %v876_v10  ;;  %v912_v22 = vsub.f32 %v1184_v49, %v876_v10 }
 0x33c   : > { %v901_v29 = vmax.f32 %v900_v20, 0.0 }
 0x33e   : > { %v902_v30 = vadd.f32 0.001, %v901_v29 }
 0x340   : > { %1264 = vrsqrt.f32 %v902_v30 }
 0x34a   : > { %v1265_v26 = vpop.eup %1264 }
 0x34b   : > { %v904_v25 = vmul.f32 %v1265_v26, %v860_v31 }
 0x34d   : > { %v916_v27 = vrot.slane %v904_v25, %v692_v56 }
 0x34f   : > { %v917_v32 = vmul.f32 %v916_v27, %v905_v14  ;;  %v918_v33 = vmul.f32 %v916_v27, %v906_v15  ;;  %v919_v38 = vmul.f32 %v916_v27, %v907_v16  ;;  %v920_v39 = vmul.f32 %v916_v27, %v908_v17 }
 0x350   : > { %v921_v42 = vmul.f32 %v916_v27, %v909_v18  ;;  %v922_v43 = vmul.f32 %v916_v27, %v910_v19  ;;  %v923_v44 = vmul.f32 %v916_v27, %v911_v21  ;;  %v924_v45 = vmul.f32 %v916_v27, %v912_v22 }
 0x351   : > { %v931_v46 = vsub.f32 %v917_v32, %v1091_v28  ;;  %v932_v47 = vsub.f32 %v918_v33, %v1091_v28  ;;  %v933_v48 = vsub.f32 %v919_v38, %v1091_v28  ;;  %v934_v49 = vsub.f32 %v920_v39, %v1091_v28 }
 0x352   : > { %v935_v50 = vsub.f32 %v921_v42, %v1091_v28  ;;  %v936_v55 = vsub.f32 %v922_v43, %v1091_v28  ;;  %v937_v54 = vsub.f32 %v923_v44, %v1091_v28  ;;  %v938_v51 = vsub.f32 %v924_v45, %v1091_v28 }
 0x353   : > { %v939_v53 = vmax.f32 %v931_v46, 0.0  ;;  %v940_v52 = vmax.f32 %v932_v47, 0.0  ;;  %v941_v56 = vmax.f32 %v933_v48, 0.0  ;;  %v942_v57 = vmax.f32 %v934_v49, 0.0 }
 0x354   : > { %v943_v58 = vmax.f32 %v935_v50, 0.0  ;;  %v944_v59 = vmax.f32 %v936_v55, 0.0  ;;  %v945_v60 = vmax.f32 %v937_v54, 0.0  ;;  %v946_v61 = vmax.f32 %v938_v51, 0.0 }
 0x355   : > { %v947_v62 = vadd.f32 %v939_v53, %v1491_v23  ;;  %v948_v63 = vadd.f32 %v940_v52, %v1494_v24  ;;  %v949_v0 = vadd.f32 %v941_v56, %v1504_v34  ;;  %v950_v1 = vadd.f32 %v942_v57, %v1507_v35 }
 0x356   : > { %v951_v2 = vadd.f32 %v943_v58, %v1510_v36  ;;  %v952_v3 = vadd.f32 %v944_v59, %v1513_v37  ;;  %v953_v4 = vadd.f32 %v945_v60, %v1520_v40  ;;  %v954_v5 = vadd.f32 %v946_v61, %v1523_v41 }
 0x357   : > { %955 = vst [vmem:[%s1472_s17] sm:$0xff] %v947_v62  ;;  %956 = vst [vmem:[%s1472_s17 + $0x8] sm:$0xff] %v948_v63 }
 0x358   : > { %957 = vst [vmem:[%s1472_s17 + $0x10] sm:$0xff] %v949_v0  ;;  %958 = vst [vmem:[%s1472_s17 + $0x18] sm:$0xff] %v950_v1 }
 0x359   : > { %959 = vst [vmem:[%s1472_s17 + $0x20] sm:$0xff] %v951_v2  ;;  %960 = vst [vmem:[%s1472_s17 + $0x28] sm:$0xff] %v952_v3 }
 0x35a   : > { %961 = vst [vmem:[%s1472_s17 + $0x30] sm:$0xff] %v953_v4  ;;  %962 = vst [vmem:[%s1472_s17 + $0x38] sm:$0xff] %v954_v5 }
 0x35b PF: > { %s20_s13 = sadd.s32 1, %s1336_s13   ;;  %s1649_s30 = smov %s1328_s11 }
 0x35c   : > { %p17_p7 = scmp.ge.s32.totalorder %s20_s13, 8   ;;  %s1650_s10 = smov %s1332_s12 }
 0x35d   : > { %s1651_s11 = smov %s1654_s15  ;;  %s1652_s12 = smov %s1658_s16 }
 0x35e   :  { %19 = sbr.rel (!%p17_p7) target bundleno = 3 (0x3), region = 101 }
 0x365   :  { %984 = vsyncpa [#allocation3], 1 }
 0x366   :  { %986 = vsyncpa [#allocation3 + $0x1], 1 }

</bundles_post_ra>
